<compile_context>
chip_gen: v6e
topology: v6e:2x2x1
jax: 0.10.0
libtpu: 0.0.40
codegen_flags: <defaults>
</compile_context>

<pallas_src>
import functools

import jax
import jax.numpy as jnp
import numpy as np
from jax import lax
from jax.experimental import pallas as pl
from jax.experimental.pallas import tpu as pltpu


def _round_up(x, m):
    return (x + m - 1) // m * m


def _embed_gather_kernel(tok_ref, we_hbm, w_ref, b_ref, o_ref,
                         gather_buf, sem, *, eps, post_ln, t_blk):
    """DMA-gather t_blk rows of W_E (double-buffered), optional fused LayerNorm."""
    blk = pl.program_id(0)
    nblk = pl.num_programs(0)
    slot = blk % 2

    def issue(block_idx, buf_slot):
        base = block_idx * t_blk

        def body(k, carry):
            tok = tok_ref[base + k]                       # scalar read from SMEM
            pltpu.make_async_copy(
                we_hbm.at[pl.ds(tok, 1), :],              # one (1, d_model) HBM row
                gather_buf.at[buf_slot, pl.ds(k, 1), :],  # row k of VMEM scratch
                sem.at[buf_slot],
            ).start()
            return carry

        lax.fori_loop(0, t_blk, body, 0)

    def wait(buf_slot):
        def body(k, carry):
            # Descriptor only supplies shape + semaphore for the wait; it
            # matches the (1, d_model) row copies issued above.
            pltpu.make_async_copy(
                we_hbm.at[pl.ds(0, 1), :],
                gather_buf.at[buf_slot, pl.ds(k, 1), :],
                sem.at[buf_slot],
            ).wait()
            return carry

        lax.fori_loop(0, t_blk, body, 0)

    # Prologue: first grid step fetches its own rows.
    @pl.when(blk == 0)
    def _():
        issue(0, 0)

    # Prefetch next block's rows into the other buffer *before* waiting, so
    # those DMAs overlap this block's compute and output writeback.
    @pl.when(blk + 1 < nblk)
    def _():
        issue(blk + 1, 1 - slot)

    wait(slot)

    rows = gather_buf[slot]
    if post_ln:
        # LayerNorm over d_model in fp32: mean-subtract, rsqrt(mean sq + eps),
        # affine with (1, d_model) params broadcast over the token block.
        x = rows.astype(jnp.float32)
        x = x - jnp.mean(x, axis=-1, keepdims=True)
        inv_scale = lax.rsqrt(jnp.mean(x * x, axis=-1, keepdims=True) + eps)
        out = (x * inv_scale) * w_ref[...] + b_ref[...]
        o_ref[...] = out.astype(o_ref.dtype)
    else:
        o_ref[...] = rows.astype(o_ref.dtype)


def embed_forward(tokens, W_E, w_ln, b_ln, *, eps=1e-5, post_embedding_ln=True,
                  t_blk=128):
    """Pallas implementation of Embed.forward (optionally with post-embedding LN)."""
    batch, pos = tokens.shape
    d_vocab, d_model = W_E.shape
    n_tok = batch * pos

    # Token block: at most `t_blk`, but never over-pad tiny inputs (keep 8-row
    # sublane alignment for the output BlockSpec).
    t_blk = int(min(t_blk, _round_up(n_tok, 8)))
    n_pad = _round_up(n_tok, t_blk)

    # Flatten, clamp out-of-range ids (avoids OOB DMA; matches JAX gather
    # semantics), pad tail with id 0 (results are sliced off).
    tok_flat = jnp.clip(tokens.reshape(n_tok).astype(jnp.int32), 0, d_vocab - 1)
    if n_pad != n_tok:
        tok_flat = jnp.pad(tok_flat, (0, n_pad - n_tok))

    w2d = w_ln.reshape(1, d_model).astype(jnp.float32)
    b2d = b_ln.reshape(1, d_model).astype(jnp.float32)

    kernel = functools.partial(_embed_gather_kernel, eps=eps,
                               post_ln=post_embedding_ln, t_blk=t_blk)

    # Explicit VMEM budget: double-buffered gather scratch + double-buffered
    # output block + LN params + headroom.  Well below the 64 MiB v7x ceiling.
    itemsize = int(np.dtype(W_E.dtype).itemsize)
    vmem_bytes = (2 * t_blk * d_model * itemsize      # gather double buffer
                  + 2 * t_blk * d_model * itemsize    # output block, double-buffered
                  + 4 * d_model * 4                   # LN w/b blocks
                  + (2 << 20))                        # headroom
    vmem_limit = int(min(max(vmem_bytes, 4 << 20), 64 << 20))

    out = pl.pallas_call(
        kernel,
        out_shape=jax.ShapeDtypeStruct((n_pad, d_model), W_E.dtype),
        grid_spec=pltpu.PrefetchScalarGridSpec(
            num_scalar_prefetch=1,                        # token ids -> SMEM
            grid=(n_pad // t_blk,),
            in_specs=[
                pl.BlockSpec(memory_space=pl.ANY),        # W_E stays in HBM
                pl.BlockSpec((1, d_model), lambda i, tok: (0, 0)),  # LN w
                pl.BlockSpec((1, d_model), lambda i, tok: (0, 0)),  # LN b
            ],
            out_specs=pl.BlockSpec((t_blk, d_model), lambda i, tok: (i, 0)),
            scratch_shapes=[
                pltpu.VMEM((2, t_blk, d_model), W_E.dtype),  # gather double buffer
                pltpu.SemaphoreType.DMA((2,)),               # one DMA sem per slot
            ],
        ),
        compiler_params=pltpu.CompilerParams(
            # Sequential grid: required for the cross-iteration prefetch chain.
            dimension_semantics=("arbitrary",),
            vmem_limit_bytes=vmem_limit,
        ),
    )(tok_flat, W_E, w2d, b2d)

    return out[:n_tok].reshape(batch, pos, d_model)


def embed_reference(tokens, W_E, w_ln, b_ln, *, eps=1e-5, post_embedding_ln=True):
    """Plain-JAX reference matching the PyTorch forward."""
    emb = W_E[tokens, :].astype(jnp.float32)
    if not post_embedding_ln:
        return emb.astype(W_E.dtype)
    x = emb - jnp.mean(emb, axis=-1, keepdims=True)
    scale = jnp.sqrt(jnp.mean(x * x, axis=-1, keepdims=True) + eps)
    return ((x / scale) * w_ln + b_ln).astype(W_E.dtype)


def _run_case(key, batch, pos, d_vocab, d_model, eps=1e-5):
    k_we, k_tok = jax.random.split(key)
    W_E = (0.02 * jax.random.normal(k_we, (d_vocab, d_model))).astype(jnp.float32)
    w_ln = jnp.ones((d_model,), dtype=jnp.float32)
    b_ln = jnp.zeros((d_model,), dtype=jnp.float32)
    tokens = jax.random.randint(k_tok, (batch, pos), 0, d_vocab, dtype=jnp.int32)

    out_plain = embed_forward(tokens, W_E, w_ln, b_ln, eps=eps,
                              post_embedding_ln=False)
    out_ln = embed_forward(tokens, W_E, w_ln, b_ln, eps=eps,
                           post_embedding_ln=True)
    jax.block_until_ready((out_plain, out_ln))

    ref_plain = embed_reference(tokens, W_E, w_ln, b_ln, eps=eps,
                                post_embedding_ln=False)
    ref_ln = embed_reference(tokens, W_E, w_ln, b_ln, eps=eps,
                             post_embedding_ln=True)

    assert out_plain.shape == (batch, pos, d_model)
    assert out_ln.shape == (batch, pos, d_model)
    np.testing.assert_allclose(np.asarray(out_plain), np.asarray(ref_plain),
                               rtol=1e-6, atol=1e-6)
    np.testing.assert_allclose(np.asarray(out_ln), np.asarray(ref_ln),
                               rtol=1e-4, atol=1e-4)


if __name__ == "__main__":
    key = jax.random.PRNGKey(0)
    k1, k2, k3 = jax.random.split(key, 3)

    # Small config matching the module: d_vocab=64, d_model=128, batch=2, pos=8.
    _run_case(k1, batch=2, pos=8, d_vocab=64, d_model=128)

    # Exercises padding (n_tok not a multiple of 8) and a sparsely-touched vocab.
    _run_case(k2, batch=3, pos=7, d_vocab=1000, d_model=256)

    # Multi-block case (3 token blocks) exercising the cross-block DMA prefetch.
    _run_case(k3, batch=2, pos=192, d_vocab=512, d_model=128)

    # TODO(synk): HookPoint (hook_scale / hook_normalized) has no Pallas
    # equivalent; hooks are identity in a plain forward pass and are omitted.
    print("KERNEL_OK")
</pallas_src>

<mosaic_0001>
module attributes {stable_mosaic.version = 11 : i64} {
  func.func @_embed_gather_kernel(%arg0: i32, %arg1: memref<16xi32, #tpu.memory_space<smem>>, %arg2: memref<64x128xf32, #tpu.memory_space<any>>, %arg3: memref<1x128xf32, #tpu.memory_space<vmem>>, %arg4: memref<1x128xf32, #tpu.memory_space<vmem>>, %arg5: memref<16x128xf32, #tpu.memory_space<vmem>>, %arg6: memref<2x16x128xf32, #tpu.memory_space<vmem>>, %arg7: memref<2x!tpu.dma_semaphore, #tpu.memory_space<semaphore_mem>>) attributes {dimension_semantics = [#tpu.dimension_semantics<arbitrary>], iteration_bounds = array<i64: 1>, scalar_prefetch = 1 : i64, scratch_operands = 2 : i64, tpu.core_type = #tpu.core_type<tc>, window_params = [{}, {pipeline_mode = #tpu.pipeline_mode<synchronous>, transform_indices = @transform_1, window_bounds = array<i64: 1, 128>}, {pipeline_mode = #tpu.pipeline_mode<synchronous>, transform_indices = @transform_2, window_bounds = array<i64: 1, 128>}, {transform_indices = @transform_3, window_bounds = array<i64: 16, 128>}]} {
    %c2_i32 = arith.constant 2 : i32
    %c0_i32 = arith.constant 0 : i32
    %0 = arith.cmpi eq, %c2_i32, %c0_i32 : i32
    %c1_i32 = arith.constant 1 : i32
    %1 = arith.select %0, %c1_i32, %c2_i32 : i32
    %2 = arith.remsi %arg0, %1 : i32
    %c0_i32_0 = arith.constant 0 : i32
    %3 = arith.cmpi ne, %2, %c0_i32_0 : i32
    %c0_i32_1 = arith.constant 0 : i32
    %4 = arith.cmpi slt, %2, %c0_i32_1 : i32
    %c0_i32_2 = arith.constant 0 : i32
    %5 = arith.cmpi slt, %1, %c0_i32_2 : i32
    %6 = arith.xori %4, %5 : i1
    %7 = arith.andi %6, %3 : i1
    %8 = arith.addi %2, %1 : i32
    %9 = arith.select %7, %8, %2 : i32
    %c0_i32_3 = arith.constant 0 : i32
    %10 = arith.cmpi eq, %arg0, %c0_i32_3 : i32
    %11 = arith.extui %10 : i1 to i32
    %c0_i32_4 = arith.constant 0 : i32
    %12 = arith.cmpi ne, %11, %c0_i32_4 : i32
    scf.if %12 {
      %c0_i32_14 = arith.constant 0 : i32
      %c16_i32_15 = arith.constant 16 : i32
      %22 = arith.addi %c0_i32_14, %c16_i32_15 : i32
      %c1_i32_16 = arith.constant 1 : i32
      scf.for %arg8 = %c0_i32_14 to %22 step %c1_i32_16  : i32 {
        %c0_i32_18 = arith.constant 0 : i32
        %23 = arith.addi %c0_i32_18, %arg8 : i32
        %24 = arith.index_cast %23 : i32 to index
        %25 = memref.load %arg1[%24] : memref<16xi32, #tpu.memory_space<smem>>
        %c0_i32_19 = arith.constant 0 : i32
        %c0_i32_20 = arith.constant 0 : i32
        %c0_i32_21 = arith.constant 0 : i32
        %26 = tpu.memref_slice %arg2[%25, %c0_i32_21] : memref<64x128xf32, #tpu.memory_space<any>> -> memref<1x128xf32, #tpu.memory_space<any>>
        %c0_i32_22 = arith.constant 0 : i32
        %27 = tpu.memref_slice %arg6[%c0_i32_19, %arg8, %c0_i32_22] : memref<2x16x128xf32, #tpu.memory_space<vmem>> -> memref<1x1x128xf32, #tpu.memory_space<vmem>>
        %28 = tpu.memref_squeeze %27 : memref<1x1x128xf32, #tpu.memory_space<vmem>> -> memref<1x128xf32, #tpu.memory_space<vmem>>
        %29 = tpu.memref_slice %arg7[%c0_i32_20] : memref<2x!tpu.dma_semaphore, #tpu.memory_space<semaphore_mem>> -> memref<1x!tpu.dma_semaphore, #tpu.memory_space<semaphore_mem>>
        %30 = tpu.memref_squeeze %29 : memref<1x!tpu.dma_semaphore, #tpu.memory_space<semaphore_mem>> -> memref<!tpu.dma_semaphore, #tpu.memory_space<semaphore_mem>>
        tpu.enqueue_dma source(%26 : memref<1x128xf32, #tpu.memory_space<any>>) target(%28 : memref<1x128xf32, #tpu.memory_space<vmem>>) target_semaphore(%30 : memref<!tpu.dma_semaphore, #tpu.memory_space<semaphore_mem>>)
      }
      %c16_i32_17 = arith.constant 16 : i32
    } else {
    }
    %c1_i32_5 = arith.constant 1 : i32
    %13 = arith.addi %arg0, %c1_i32_5 : i32
    %c1_i32_6 = arith.constant 1 : i32
    %14 = arith.cmpi slt, %13, %c1_i32_6 : i32
    %15 = arith.extui %14 : i1 to i32
    %c0_i32_7 = arith.constant 0 : i32
    %16 = arith.cmpi ne, %15, %c0_i32_7 : i32
    scf.if %16 {
      %c1_i32_14 = arith.constant 1 : i32
      %22 = arith.addi %arg0, %c1_i32_14 : i32
      %c1_i32_15 = arith.constant 1 : i32
      %23 = arith.subi %c1_i32_15, %9 : i32
      %c16_i32_16 = arith.constant 16 : i32
      %24 = arith.muli %22, %c16_i32_16 : i32
      %c0_i32_17 = arith.constant 0 : i32
      %c16_i32_18 = arith.constant 16 : i32
      %25 = arith.addi %c0_i32_17, %c16_i32_18 : i32
      %c1_i32_19 = arith.constant 1 : i32
      scf.for %arg8 = %c0_i32_17 to %25 step %c1_i32_19  : i32 {
        %26 = arith.addi %24, %arg8 : i32
        %27 = arith.index_cast %26 : i32 to index
        %28 = memref.load %arg1[%27] : memref<16xi32, #tpu.memory_space<smem>>
        %c0_i32_21 = arith.constant 0 : i32
        %29 = tpu.memref_slice %arg2[%28, %c0_i32_21] : memref<64x128xf32, #tpu.memory_space<any>> -> memref<1x128xf32, #tpu.memory_space<any>>
        %c0_i32_22 = arith.constant 0 : i32
        %30 = tpu.memref_slice %arg6[%23, %arg8, %c0_i32_22] : memref<2x16x128xf32, #tpu.memory_space<vmem>> -> memref<1x1x128xf32, #tpu.memory_space<vmem>>
        %31 = tpu.memref_squeeze %30 : memref<1x1x128xf32, #tpu.memory_space<vmem>> -> memref<1x128xf32, #tpu.memory_space<vmem>>
        %32 = tpu.memref_slice %arg7[%23] : memref<2x!tpu.dma_semaphore, #tpu.memory_space<semaphore_mem>> -> memref<1x!tpu.dma_semaphore, #tpu.memory_space<semaphore_mem>>
        %33 = tpu.memref_squeeze %32 : memref<1x!tpu.dma_semaphore, #tpu.memory_space<semaphore_mem>> -> memref<!tpu.dma_semaphore, #tpu.memory_space<semaphore_mem>>
        tpu.enqueue_dma source(%29 : memref<1x128xf32, #tpu.memory_space<any>>) target(%31 : memref<1x128xf32, #tpu.memory_space<vmem>>) target_semaphore(%33 : memref<!tpu.dma_semaphore, #tpu.memory_space<semaphore_mem>>)
      }
      %c16_i32_20 = arith.constant 16 : i32
    } else {
    }
    %c0_i32_8 = arith.constant 0 : i32
    %c16_i32 = arith.constant 16 : i32
    %17 = arith.addi %c0_i32_8, %c16_i32 : i32
    %c1_i32_9 = arith.constant 1 : i32
    scf.for %arg8 = %c0_i32_8 to %17 step %c1_i32_9  : i32 {
      %c0_i32_14 = arith.constant 0 : i32
      %c0_i32_15 = arith.constant 0 : i32
      %22 = tpu.memref_slice %arg2[%c0_i32_14, %c0_i32_15] : memref<64x128xf32, #tpu.memory_space<any>> -> memref<1x128xf32, #tpu.memory_space<any>>
      %c0_i32_16 = arith.constant 0 : i32
      %23 = tpu.memref_slice %arg6[%9, %arg8, %c0_i32_16] : memref<2x16x128xf32, #tpu.memory_space<vmem>> -> memref<1x1x128xf32, #tpu.memory_space<vmem>>
      %24 = tpu.memref_squeeze %23 : memref<1x1x128xf32, #tpu.memory_space<vmem>> -> memref<1x128xf32, #tpu.memory_space<vmem>>
      %25 = tpu.memref_slice %arg7[%9] : memref<2x!tpu.dma_semaphore, #tpu.memory_space<semaphore_mem>> -> memref<1x!tpu.dma_semaphore, #tpu.memory_space<semaphore_mem>>
      %26 = tpu.memref_squeeze %25 : memref<1x!tpu.dma_semaphore, #tpu.memory_space<semaphore_mem>> -> memref<!tpu.dma_semaphore, #tpu.memory_space<semaphore_mem>>
      tpu.wait_dma2 semaphore(%26 : memref<!tpu.dma_semaphore, #tpu.memory_space<semaphore_mem>>) src(%22 : memref<1x128xf32, #tpu.memory_space<any>>) dst(%24 : memref<1x128xf32, #tpu.memory_space<vmem>>)
    }
    %c16_i32_10 = arith.constant 16 : i32
    %18 = arith.index_cast %9 : i32 to index
    %c0 = arith.constant 0 : index
    %c0_11 = arith.constant 0 : index
    %19 = vector.load %arg6[%18, %c0, %c0_11] : memref<2x16x128xf32, #tpu.memory_space<vmem>>, vector<1x16x128xf32>
    %20 = vector.shape_cast %19 : vector<1x16x128xf32> to vector<16x128xf32>
    %c0_12 = arith.constant 0 : index
    %c0_13 = arith.constant 0 : index
    %21 = vector.load %arg5[%c0_12, %c0_13] : memref<16x128xf32, #tpu.memory_space<vmem>>, vector<16x128xf32>
    tpu.vector_store %arg5[%c0_12, %c0_13], %20 {strides = array<i32>} : memref<16x128xf32, #tpu.memory_space<vmem>>, vector<16x128xf32>,
    return
  }
  func.func @transform_1(%arg0: i32, %arg1: memref<16xi32, #tpu.memory_space<smem>>) -> (i32, i32) {
    %c0_i32 = arith.constant 0 : i32
    %c0_i32_0 = arith.constant 0 : i32
    %c0_i32_1 = arith.constant 0 : i32
    return %c0_i32, %c0_i32_0 : i32, i32
  }
  func.func @transform_2(%arg0: i32, %arg1: memref<16xi32, #tpu.memory_space<smem>>) -> (i32, i32) {
    %c0_i32 = arith.constant 0 : i32
    %c0_i32_0 = arith.constant 0 : i32
    %c0_i32_1 = arith.constant 0 : i32
    return %c0_i32, %c0_i32_0 : i32, i32
  }
  func.func @transform_3(%arg0: i32, %arg1: memref<16xi32, #tpu.memory_space<smem>>) -> (i32, i32) {
    %c0_i32 = arith.constant 0 : i32
    %c0_i32_0 = arith.constant 0 : i32
    return %arg0, %c0_i32 : i32, i32
  }
}

</mosaic_0001>

<bundles_post_ra>
// kernel: tpu_custom_call.1
= control target key start
LH: loop header
LB: loop body
LE: loop exit
PB: predicated region body
PF: predicated region fallthrough
CT: control target
= control target key end

     0   :  { %s254_s15 = smov [#allocation5]   ;;  %s309_s0 = inlined_call_operand.hbm [shape: s32[16], index: 0, kind: input, shape index: {}]   ;;  %s310_s1 = inlined_call_operand.hbm [shape: f32[64,128], index: 1, kind: input, shape index: {}]   ;;  %s311_s2 = inlined_call_operand.vmem [shape: f32[1,128], index: 2, kind: input, shape index: {}]   ;;  %s312_s3 = inlined_call_operand.vmem [shape: f32[1,128], index: 3, kind: input, shape index: {}]   ;;  %s313_s4 = inlined_call_operand.hbm [shape: f32[16,128], index: 4, kind: output, shape index: {}]  }
   0x1   :  { %10 = dma.hbm_to_smem %s309_s0, 16, %s254_s15, [#allocation4] }
   0x2   :  { %240 = dma.done.wait [#allocation4], 16 }
   0x3   :  { %241 = vsyncadd [#allocation4], 4294967280 }
   0x4   :  { %12 = sfence }
   0x5   :  { %13 = vsyncpa [#allocation7], 0  ;;  %s287_s18 = smov 0  }
   0x6 LB: > { %s36_s2 = sld [smem:[#allocation5 + %s248_s18]]  ;;  %s39_s3 = scalar_lea.vmem [#allocation2], %s248_s18  ;;  %s248_s18 = sphi %s287_s18, %s35_s18  }
   0x7   : > { %s47_s19 = sshll.u32 %s39_s3, 4  ;;  %s192_s26 = scalar_lea.hbm %s310_s1, 1024  ;;  %s48_s19 = int_to_ptr.vmem [resolvable:$true] %s47_s19 }
   0xc   : > { %s155_s20 = sshll.u32 %s36_s2, 4 }
   0xd   : > { %s38_s22 = scalar_lea.hbm %s310_s1, %s155_s20 }
   0xe   : > { %s190_s23 = scalar_lea.hbm %s38_s22, 16  ;;  %p193_p1 = scmp.lt.s32.totalorder %s38_s22, %s310_s1 }
   0xf   : > { %p191_p0 = scmp.ne.s32.totalorder %s38_s22, %s190_s23  ;;  %p194_p2 = scmp.lt.s32.totalorder %s192_s26, %s190_s23 }
  0x11   : > { %p195_p3 = por %p194_p2, %p193_p1 }
  0x13   : > { %p196_p4 = pnand %p195_p3, %p191_p0 }
  0x15   : > { %199 = shalt.err (!%p196_p4)  }
  0x16   : > { %s200_s29 = scalar_lea.vmem %s48_s19, 16  ;;  %s255_s30 = smov [#allocation2]  }
  0x17   : > { %p201_p5 = scmp.ne.s32.totalorder %s48_s19, %s200_s29  ;;  %s202_s5 = sshll.u32 %s255_s30, 4  ;;  %s203_s5 = int_to_ptr.vmem [resolvable:$false] %s202_s5 }
  0x18   : > { %s204_s6 = scalar_lea.vmem %s203_s5, 512  ;;  %p205_p6 = scmp.lt.s32.totalorder %s48_s19, %s203_s5 }
  0x19   : > { %p206_p7 = scmp.lt.s32.totalorder %s204_s6, %s200_s29 }
  0x1b   : > { %p207_p8 = por %p206_p7, %p205_p6 }
  0x1d   : > { %p208_p9 = pnand %p207_p8, %p201_p5 }
  0x1f   : > { %211 = shalt.err (!%p208_p9)  }
  0x20   : > { %50 = dma.hbm_to_vmem [thread:$0]  %s38_s22, 16, %s48_s19, [#allocation3] }
  0x21   : > { %s35_s18 = sadd.s32 1, %s248_s18  }
  0x22   : > { %p32_p10 = scmp.ge.s32.totalorder %s35_s18, 16  }
  0x23   :  { %s250_s7 = smov (%p32_p10), 0  }
  0x24   :  { %34 = sbr.rel (!%p32_p10) target bundleno = 6 (0x6), region = 73 }
  0x29 LB: > { %242 = dma.done.wait [#allocation3], 16  ;;  %s252_s7 = sphi %s250_s7, %s88_s7  }
  0x2a   : > { %243 = vsyncadd [#allocation3], 4294967280  ;;  %s88_s7 = sadd.s32 1, %s252_s7  }
  0x2b   : > { %p85_p11 = scmp.ge.s32.totalorder %s88_s7, 16  }
  0x2c   :  { %v95_v0 = vld [vmem:[#allocation2] sm:$0xff] (%p85_p11)  ;;  %v96_v1 = vld [vmem:[#allocation2 + $0x8] sm:$0xff] (%p85_p11)  ;;  %s256_s8 = smov (%p85_p11), [#allocation6]  }
  0x2d   :  { %87 = sbr.rel (!%p85_p11) target bundleno = 41 (0x29), region = 95  ;;  %97 = vst [vmem:[#allocation6] sm:$0xff] (%p85_p11), %v95_v0  ;;  %98 = vst [vmem:[#allocation6 + $0x8] sm:$0xff] (%p85_p11), %v96_v1  ;;  %s104_s9 = sshll.u32 (%p85_p11), %s256_s8, 4  ;;  %s105_s9 = int_to_ptr.vmem [resolvable:$true] %s104_s9 }
  0x2e   :  { %s212_s10 = scalar_lea.vmem (%p85_p11), %s105_s9, 256  ;;  %p217_p13 = scmp.lt.s32.totalorder (%p85_p11), %s105_s9, %s105_s9 }
  0x2f   :  { %p213_p12 = scmp.ne.s32.totalorder (%p85_p11), %s105_s9, %s212_s10  ;;  %p218_p0 = scmp.lt.s32.totalorder (%p85_p11), %s212_s10, %s212_s10 }
  0x31   :  { %p219_p1 = por (%p85_p11), %p218_p0, %p217_p13 }
  0x33   :  { %p220_p2 = pnand %p219_p1, %p213_p12 }
  0x35   :  { %223 = shalt.err (!%p220_p2)
}
  0x36   :  { %s257_s1 = smov 128   ;;  %s258_s11 = smov 8  }
  0x37   :  { %110 = dma.vmem_to_hbm [thread:$0]  %s105_s9, 256, %s313_s4, [#allocation7], %s257_s1, %s257_s1, %s258_s11  }
  0x38   :  { %244 = dma.done.wait [#allocation7], 256  }
  0x39   :  { %245 = vsyncadd [#allocation7], 4294967040 }
  0x3a   :  { %114 = vsyncpa [#allocation7], 1 }
  0x3b   :  { %115 = vsyncmov [#allocation3] }
  0x3e   :  { %s116_s14 = vpop.sfrf %115 }
  0x3f   :  { %p158_p3 = scmp.ne.s32.totalorder %s116_s14, 0 }
  0x41   :  { %120 = shalt.err (%p158_p3)  }
  0x42   :  { %122 = vsyncmov [#allocation3 + $0x1] }
  0x45   :  { %s123_s15 = vpop.sfrf %122 }
  0x46   :  { %p159_p4 = scmp.ne.s32.totalorder %s123_s15, 0 }
  0x48   :  { %127 = shalt.err (%p159_p4)  }

</bundles_post_ra>
